<compile_context>
chip_gen: v6e
topology: v6e:2x2x1
jax: 0.10.0
libtpu: 0.0.40
codegen_flags: <defaults>
</compile_context>

<pallas_src>
import jax
import jax.numpy as jnp
from jax import lax
from jax.experimental import pallas as pl
from jax.experimental.pallas import tpu as pltpu

NUM_CLASSES = 5
CLASS_IDX = 2                       # the `c` passed to Kernel/NTKernel
IMG_C, IMG_H, IMG_W = 3, 84, 84     # hardcoded reshape inside NTKernel.forward


# ---------------------------------------------------------------------------
# Small synthetic CNN standing in for the `net` passed to Kernel.__init__.
# ---------------------------------------------------------------------------
def init_net_params(key):
    k1, k2, k3, k4 = jax.random.split(key, 4)
    conv_w = 0.1 * jax.random.normal(k1, (4, IMG_C, 5, 5), jnp.float32)   # OIHW
    conv_b = 0.1 * jax.random.normal(k2, (4,), jnp.float32)
    # conv stride 12, VALID: 84 -> 7 spatial; flattened features = 4*7*7 = 196
    fc_w = 0.1 * jax.random.normal(k3, (NUM_CLASSES, 4 * 7 * 7), jnp.float32)
    fc_b = 0.1 * jax.random.normal(k4, (NUM_CLASSES,), jnp.float32)
    return {"conv_w": conv_w, "conv_b": conv_b, "fc_w": fc_w, "fc_b": fc_b}


def net_apply(params, x):                          # x: (B, C, H, W)  NCHW
    y = lax.conv_general_dilated(
        x, params["conv_w"], window_strides=(12, 12), padding="VALID",
        dimension_numbers=("NCHW", "OIHW", "NCHW"))
    y = y + params["conv_b"][None, :, None, None]
    y = jax.nn.relu(y)
    y = y.reshape(y.shape[0], -1)
    return y @ params["fc_w"].T + params["fc_b"]   # (B, NUM_CLASSES)


def fnet_class_c(params, x):                       # x: (C, H, W)
    # Class-c scalar output.  jacrev of this scalar is 1/5 the autodiff work of
    # differentiating the full 5-class output and then slicing (same result:
    # the original computes jac[:, c, :] of the full Jacobian).
    return net_apply(params, x[None])[0, CLASS_IDX]


# ---------------------------------------------------------------------------
# Pallas kernel: single-shot  o = outputscale * J @ J.T
#   * no grid (whole J resident in VMEM)      -> no per-step pipeline overhead
#   * single J operand (gram from one ref)    -> half the DMA bytes / buffers
#   * NT-form lax.dot_general                 -> no materialized transpose
# ---------------------------------------------------------------------------
def _gram_kernel(scale_ref, j_ref, o_ref):
    j = j_ref[...]
    gram = lax.dot_general(
        j, j,
        dimension_numbers=(((1,), (1,)), ((), ())),   # contract feature axis (NT)
        preferred_element_type=jnp.float32)
    o_ref[...] = scale_ref[0] * gram


def ntk_gram(J, outputscale):
    """J: (N, F) float32 Jacobian matrix -> (N, N) = outputscale * J @ J.T."""
    N, _ = J.shape
    scale_arr = jnp.reshape(outputscale.astype(jnp.float32), (1,))
    return pl.pallas_call(
        _gram_kernel,
        out_shape=jax.ShapeDtypeStruct((N, N), jnp.float32),
        in_specs=[pl.BlockSpec(memory_space=pltpu.MemorySpace.SMEM),   # scalar scale
                  pl.BlockSpec(memory_space=pltpu.MemorySpace.VMEM)],  # full J, no pad
        out_specs=pl.BlockSpec(memory_space=pltpu.MemorySpace.VMEM),
    )(scale_arr, J.astype(jnp.float32))


# ---------------------------------------------------------------------------
# Kernel.forward equivalent (jittable end-to-end)
# ---------------------------------------------------------------------------
@jax.jit
def kernel_forward(x, params, scaling_params, raw_outputscale):
    N = x.shape[0]
    imgs = x.reshape(N, IMG_C, IMG_H, IMG_W)

    # Per-sample Jacobian of the class-c logit wrt all parameters
    # (== vmap(jacrev(fnet_single))[...][:, c, :] of NTKernel.forward).
    jac = jax.vmap(jax.jacrev(fnet_class_c, argnums=0),
                   in_axes=(None, 0))(params, imgs)

    # scale per-parameter, flatten, concat:  sum_k J_k @ J_k.T == J @ J.T
    pieces = [(scaling_params[name] * jac[name]).reshape(N, -1) for name in jac]
    J = jnp.concatenate(pieces, axis=1)                 # (N, F)

    # gpytorch ScaleKernel: outputscale = softplus(raw_outputscale)
    outputscale = jax.nn.softplus(raw_outputscale)
    covar = ntk_gram(J, outputscale)                    # Pallas hot path

    # while not all(eigvals(covar).real > 1e-6): covar += 1e-6 * I
    # covar is symmetric, so eig(.).real == eigvalsh(.).  lax.while_loop keeps
    # the exact iterative semantics while staying jittable (no host sync).
    eye = jnp.eye(N, dtype=covar.dtype)

    def cond(c):
        return jnp.logical_not(jnp.all(jnp.linalg.eigvalsh(c) > 1e-6))

    def body(c):
        return c + 1e-6 * eye

    covar = lax.while_loop(cond, body, covar)

    # TODO(synk): Kernel.predict (cholesky_solve / MultivariateNormal) not ported;
    # only the forward pass was requested.
    return covar


if __name__ == "__main__":
    key = jax.random.PRNGKey(0)
    kp, kx = jax.random.split(key)

    params = init_net_params(kp)
    # scaling_params (one multiplier per named parameter), set deterministically.
    scaling_params = {"conv_w": 1.0, "conv_b": 0.5, "fc_w": 2.0, "fc_b": 1.5}
    raw_outputscale = jnp.float32(0.0)

    N = 8
    x = jax.random.normal(kx, (N, IMG_C * IMG_H * IMG_W), jnp.float32)

    covar = kernel_forward(x, params, scaling_params, raw_outputscale)
    covar = jax.block_until_ready(covar)
    assert covar.shape == (N, N) and covar.dtype == jnp.float32
    print("KERNEL_OK")
</pallas_src>

<mosaic_0001>
module attributes {stable_mosaic.version = 11 : i64} {
  func.func @_gram_kernel(%arg0: memref<1xf32, #tpu.memory_space<smem>>, %arg1: memref<8x1289xf32, #tpu.memory_space<vmem>>, %arg2: memref<8x8xf32, #tpu.memory_space<vmem>>) attributes {dimension_semantics = [], scalar_prefetch = 0 : i64, scratch_operands = 0 : i64, tpu.core_type = #tpu.core_type<tc>} {
    %c0 = arith.constant 0 : index
    %c0_0 = arith.constant 0 : index
    %0 = vector.load %arg1[%c0, %c0_0] : memref<8x1289xf32, #tpu.memory_space<vmem>>, vector<8x1289xf32>
    %cst = arith.constant dense<0.000000e+00> : vector<8x8xf32>
    %1 = tpu.matmul %0, %0, %cst {dimension_numbers = #tpu.dot_dimension_numbers<[1], [1], [0], [0], [0, 0, 1, 0], [], []>} : vector<8x1289xf32>, vector<8x1289xf32>, vector<8x8xf32> -> vector<8x8xf32>
    %c0_1 = arith.constant 0 : index
    %2 = memref.load %arg0[%c0_1] : memref<1xf32, #tpu.memory_space<smem>>
    %3 = vector.broadcast %2 : f32 to vector<8x8xf32>
    %4 = arith.mulf %3, %1 : vector<8x8xf32>
    %c0_2 = arith.constant 0 : index
    %c0_3 = arith.constant 0 : index
    %5 = vector.load %arg2[%c0_2, %c0_3] : memref<8x8xf32, #tpu.memory_space<vmem>>, vector<8x8xf32>
    tpu.vector_store %arg2[%c0_2, %c0_3], %4 {strides = array<i32>} : memref<8x8xf32, #tpu.memory_space<vmem>>, vector<8x8xf32>,
    return
  }
}

</mosaic_0001>

<bundles_post_ra>
// kernel: kernel_forward.1
= control target key start
LH: loop header
LB: loop body
LE: loop exit
PB: predicated region body
PF: predicated region fallthrough
CT: control target
= control target key end

     0   :  { %s558_s0 = inlined_call_operand.<no memory space> [shape: f32[1], index: 0, kind: input, shape index: {}]   ;;  %s559_s1 = inlined_call_operand.vmem [shape: f32[8,1289], index: 1, kind: input, shape index: {}]   ;;  %s560_s2 = inlined_call_operand.hbm [shape: f32[8,8], index: 2, kind: output, shape index: {}]  }
   0x1   :  { %v14_v0 = vld [vmem:[%s559_s1 + $0x8] sm:$0xff]  ;;  %v13_v1 = vld [vmem:[%s559_s1] sm:$0xff]  ;;  %v16_v2 = vld [vmem:[%s559_s1 + $0x18] sm:$0xff] }
   0x2   :  { %58 = vmatprep.subr.mxu0 %v14_v0  ;;  %128 = vmatprep.subr.mxu1 %v16_v2  ;;  %v15_v3 = vld [vmem:[%s559_s1 + $0x10] sm:$0xff]  ;;  %v18_v4 = vld [vmem:[%s559_s1 + $0x28] sm:$0xff]  ;;  %v20_v5 = vld [vmem:[%s559_s1 + $0x38] sm:$0xff] }
   0x3   :  { %59 = vmatpush1.xpose.msra.mxu0 %v13_v1  ;;  %129 = vmatpush1.xpose.msra.mxu1 %v15_v3  ;;  %v17_v6 = vld [vmem:[%s559_s1 + $0x20] sm:$0xff]  ;;  %v19_v7 = vld [vmem:[%s559_s1 + $0x30] sm:$0xff] }
   0x4   :  { %92 = vmatprep.mubr.f32.mxu0 %v14_v0  ;;  %162 = vmatprep.mubr.f32.mxu1 %v16_v2 }
   0x5   :  { %8 = vsyncpa [#allocation4], 0  ;;  %198 = vmatprep.subr.mxu0 %v18_v4  ;;  %268 = vmatprep.subr.mxu1 %v20_v5  ;;  %v22_v8 = vld [vmem:[%s559_s1 + $0x48] sm:$0xff]  ;;  %v21_v9 = vld [vmem:[%s559_s1 + $0x40] sm:$0xff]  ;;  %vm24_vm0 = vcmask 72704   ;;  %v501_v11 = vmov 0.0   ;;  %v449_v26 = vstv %s558_s0 }
   0x6   :  { %93 = vmatmul.mubr.f32.vlgmr.msra.gmra.mxu0 %v13_v1  ;;  %163 = vmatmul.mubr.f32.vlgmr.msra.gmra.mxu1 %v15_v3  ;;  %v23_v10 = vld [vmem:[%s559_s1 + $0x50] sm:$0xff]  ;;  %vm502_vm1 = vmmov 0   ;;  %s503_s4 = smov [#allocation3]   ;;  %vm451_vm2 = vcmask 64512  }
   0x7   :  { %199 = vmatpush1.xpose.msra.mxu0 %v17_v6  ;;  %269 = vmatpush1.xpose.msra.mxu1 %v19_v7  ;;  %s459_s5 = sshll.u32 %s503_s4, 4  ;;  %s460_s5 = int_to_ptr.vmem [resolvable:$true] %s459_s5 }
   0x8   :  { %232 = vmatprep.mubr.f32.mxu0 %v18_v4  ;;  %302 = vmatprep.mubr.f32.mxu1 %v20_v5  ;;  %s479_s6 = scalar_lea.vmem %s460_s5, 128  ;;  %p484_p1 = scmp.lt.s32.totalorder %s460_s5, %s460_s5 }
   0x9   :  { %338 = vmatprep.subr.mxu0 %v22_v8  ;;  %471 = vmatprep.subr.mxu1 %v501_v11  ;;  %p480_p0 = scmp.ne.s32.totalorder %s460_s5, %s479_s6  ;;  %p485_p2 = scmp.lt.s32.totalorder %s479_s6, %s479_s6 }
   0xa   :  { %233 = vmatmul.mubr.f32.vlgmr.msra.gmra.mxu0 %v17_v6  ;;  %303 = vmatmul.mubr.f32.vlgmr.msra.gmra.mxu1 %v19_v7 }
   0xb   :  { %339 = vmatpush1.xpose.msra.mxu0 %v21_v9  ;;  %472 = vmatpush3.xpose.msk.msra.mxu1 %vm24_vm0, %v23_v10  ;;  %p486_p3 = por %p485_p2, %p484_p1 }
   0xc   :  { %372 = vmatprep.mubr.f32.mxu0 %v22_v8  ;;  %473 = vmatprep.mubr.msk.f32.mxu1 %vm502_vm1, %v501_v11 }
   0xd   :  { %p487_p4 = pnand %p486_p3, %p480_p0 }
   0xe   :  { %373 = vmatmul.mubr.f32.vlgmr.msra.gmra.mxu0 %v21_v9  ;;  %474 = vmatmul.mubr.msk.f32.vlgmr.msra.gmra.mxu1 %vm24_vm0, %v23_v10 }
  0xc6   :  { %v94_v12 = vpop.f32.mrf.mxu0  ;;  %v164_v13 = vpop.f32.mrf.mxu1 }
  0xc7   :  { %v165_v16 = vadd.f32 %v164_v13, %v94_v12 }
  0xc8   :  { %v96_v14 = vpop.f32.mrf.mxu0  ;;  %v166_v15 = vpop.f32.mrf.mxu1 }
  0xca   :  { %v234_v17 = vpop.f32.mrf.mxu0  ;;  %v304_v18 = vpop.f32.mrf.mxu1 }
  0xcb   :  { %v235_v19 = vadd.f32 %v234_v17, %v165_v16 }
  0xcc   :  { %v236_v20 = vpop.f32.mrf.mxu0  ;;  %v306_v21 = vpop.f32.mrf.mxu1 }
  0xcd   :  { %v305_v22 = vadd.f32 %v304_v18, %v235_v19 }
  0xce   :  { %v374_v23 = vpop.f32.mrf.mxu0  ;;  %v444_v24 = vpop.f32.mrf.mxu1 }
  0xcf   :  { %v375_v25 = vadd.f32 %v374_v23, %v305_v22 }
  0xd0   :  { %v376_v27 = vpop.f32.mrf.mxu0  ;;  %v475_v28 = vpop.f32.mrf.mxu1 }
  0xd1   :  { %v445_v29 = vadd.f32 %v444_v24, %v375_v25 }
  0xd3   :  { %v450_v30 = vmul.f32 %v449_v26, %v445_v29 }
  0xd5   :  { %452 = vst.msk [vmem:[#allocation3] sm:$0xff] %vm451_vm2, %v450_v30 }
  0xd6   :  { %490 = shalt.err (!%p487_p4)
}
  0xd7   :  { %462 = dma.vmem_to_hbm [thread:$0]  %s460_s5, 128, %s560_s2, [#allocation4]  }
  0xd8   :  { %499 = dma.done.wait [#allocation4], 128  }
  0xd9   :  { %500 = vsyncadd [#allocation4], 4294967168 }
  0xda   :  { %466 = vsyncpa [#allocation4], 1 }

// kernel: custom-call.4
= control target key start
LH: loop header
LB: loop body
LE: loop exit
PB: predicated region body
PF: predicated region fallthrough
CT: control target
= control target key end

     0   :  { %11 = vsyncpa [#allocation14], 0  ;;  %s1829_s0 = inlined_call_operand.vmem [shape: f32[4,4], index: 0, kind: input, shape index: {}]   ;;  %s1830_s1 = inlined_call_operand.vmem [shape: f32[4,4], index: 1, kind: input, shape index: {}]   ;;  %s1831_s2 = inlined_call_operand.vmem [shape: f32[4,4], index: 2, kind: input, shape index: {}]   ;;  %s1832_s3 = inlined_call_operand.vmem [shape: f32[4,4], index: 3, kind: input, shape index: {}]   ;;  %s1833_s4 = inlined_call_operand.vmem [shape: f32[4], index: 4, kind: output, shape index: {0}]   ;;  %s1834_s5 = inlined_call_operand.vmem [shape: f32[4], index: 5, kind: output, shape index: {1}]   ;;  %s1835_s6 = inlined_call_operand.hbm [shape: f32[4,4], index: 6, kind: output, shape index: {2}]   ;;  %s1836_s7 = inlined_call_operand.hbm [shape: f32[4,4], index: 7, kind: output, shape index: {3}]   ;;  %s1837_s8 = inlined_call_operand.hbm [shape: f32[4,4], index: 8, kind: output, shape index: {4}]   ;;  %s1838_s9 = inlined_call_operand.hbm [shape: f32[4,4], index: 9, kind: output, shape index: {5}]  }
   0x1   :  { %12 = vsyncpa [#allocation17], 0 }
   0x2   :  { %13 = vsyncpa [#allocation22], 0  ;;  %v75_v0 = vld [vmem:[%s1829_s0] sm:$0xf]  ;;  %v303_v2 = vlaneseq  ;;  %v1541_v7 = vmov 0.0   ;;  %s302_s0 = smov [#allocation12] }
   0x3   :  { %v138_v1 = vld [vmem:[%s1830_s1] sm:$0xf]  ;;  %76 = vst [vmem:[#allocation1] sm:$0xf] %v75_v0  ;;  %298 = vst [vmem:[#allocation12] sm:$0xff] %v1541_v7  ;;  %s315_s1 = smov [#allocation20] }
   0x4   :  { %139 = vst [vmem:[#allocation3] sm:$0xf] %v138_v1  ;;  %v201_v3 = vld [vmem:[%s1831_s2] sm:$0xf]  ;;  %v1610_v5 = vand.u32 127, %v303_v2  ;;  %v1612_v6 = vshrl.u32 %v303_v2, 7 }
   0x5   :  { %v264_v4 = vld [vmem:[%s1832_s3] sm:$0xf]  ;;  %202 = vst [vmem:[#allocation5] sm:$0xf] %v201_v3  ;;  %299 = vst [vmem:[#allocation15] sm:$0xff] %v1541_v7  ;;  %s286_s2 = smov [#allocation23] }
   0x6   :  { %265 = vst [vmem:[#allocation7] sm:$0xf] %v264_v4  ;;  %300 = vst [vmem:[#allocation18] sm:$0xff] %v1541_v7  ;;  %v305_v5 = vmov %v1610_v5  ;;  %v308_v6 = vmov %v1612_v6  ;;  %s289_s3 = smov [#allocation24]  ;;  %s292_s17 = smov [#allocation25]  ;;  %vm1245_vm2 = vcmp.lt.s32.totalorder %v1610_v5, 4 }
   0x7   :  { %301 = vst [vmem:[#allocation20] sm:$0xff] %v1541_v7  ;;  %v318_v5 = vmov %v1610_v5  ;;  %v321_v6 = vmov %v1612_v6  ;;  %vm312_vm0 = vcmp.eq.s32.totalorder %v308_v6, %v305_v5  ;;  %s295_s18 = smov [#allocation26]  ;;  %s1241_s19 = smov [#allocation23] }
   0x8   :  { %vm325_vm1 = vcmp.eq.s32.totalorder %v321_v6, %v318_v5  ;;  %s1258_s20 = smov [#allocation24]  ;;  %v1237_v5 = vmov %v1610_v5  ;;  %v1240_v6 = vmov %v1612_v6  ;;  %s1275_s21 = smov [#allocation25] }
   0x9   :  { %s1292_s22 = smov [#allocation26]  ;;  %vm1250_vm3 = vcmp.eq.s32.totalorder %v1240_v6, %v1237_v5  ;;  %v1288_v5 = vmov %v1610_v5  ;;  %v1257_v6 = vmov %v1612_v6 }
   0xa   :  { %v269_v8 = vld [vmem:[#allocation1] sm:$0xf]  ;;  %v309_v12 = vld [vmem:[%s302_s0] sm:$0xf]  ;;  %v1254_v5 = vmov %v1610_v5  ;;  %v1291_v6 = vmov %v1612_v6 }
   0xb   :  { %v274_v9 = vld [vmem:[#allocation3] sm:$0xf]  ;;  %270 = vst [vmem:[#allocation0] sm:$0xf] %v269_v8  ;;  %v313_v14 = vsel %vm312_vm0, 1.0, %v309_v12  ;;  %v1271_v5 = vmov %v1610_v5  ;;  %v1274_v6 = vmov %v1612_v6  ;;  %vm1301_vm4 = vcmp.eq.s32.totalorder %v1291_v6, %v1288_v5 }
   0xc   :  { %275 = vst [vmem:[#allocation2] sm:$0xf] %v274_v9  ;;  %v279_v10 = vld [vmem:[#allocation5] sm:$0xf]  ;;  %314 = vst [vmem:[%s302_s0] sm:$0xf] %v313_v14 }
   0xd   :  { %v284_v11 = vld [vmem:[#allocation7] sm:$0xf]  ;;  %280 = vst [vmem:[#allocation4] sm:$0xf] %v279_v10 }
   0xe   :  { %285 = vst [vmem:[#allocation6] sm:$0xf] %v284_v11  ;;  %v322_v13 = vld [vmem:[%s315_s1] sm:$0xf] }
   0xf   :  { %v326_v15 = vsel %vm325_vm1, 1.0, %v322_v13 }
  0x10   :  { %327 = vst [vmem:[%s315_s1] sm:$0xf] %v326_v15 }
  0x12   :  { %v287_v16 = vld [vmem:[#allocation0] sm:$0xff] }
  0x13   :  { %v290_v17 = vld [vmem:[#allocation2] sm:$0xff]  ;;  %288 = vst [vmem:[%s286_s2] sm:$0xff] %v287_v16 }
  0x14   :  { %291 = vst [vmem:[%s289_s3] sm:$0xff] %v290_v17  ;;  %v293_v18 = vld [vmem:[#allocation4] sm:$0xff] }
  0x15   :  { %v296_v19 = vld [vmem:[#allocation6] sm:$0xff]  ;;  %294 = vst [vmem:[%s292_s17] sm:$0xff] %v293_v18 }
  0x16   :  { %297 = vst [vmem:[%s295_s18] sm:$0xff] %v296_v19 }
  0x1a   :  { %v1247_v20 = vld [vmem:[%s1241_s19] sm:$0xf] }
  0x1b   :  { %v1264_v21 = vld [vmem:[%s1258_s20] sm:$0xf]  ;;  %v1248_v22 = vsel %vm1245_vm2, %v1247_v20, 0.0 }
  0x1c   :  { %v1265_v23 = vsel %vm1245_vm2, %v1264_v21, 0.0  ;;  %v1281_v24 = vld [vmem:[%s1275_s21] sm:$0xf]  ;;  %v1249_v26 = vmul.f32 %v1248_v22, %v1248_v22 }
  0x1d   :  { %v1298_v25 = vld [vmem:[%s1292_s22] sm:$0xf]  ;;  %v1266_v27 = vmul.f32 %v1265_v23, %v1265_v23  ;;  %v1282_v28 = vsel %vm1245_vm2, %v1281_v24, 0.0 }
  0x1e   :  { %v1299_v29 = vsel %vm1245_vm2, %v1298_v25, 0.0  ;;  %v1283_v30 = vmul.f32 %v1282_v28, %v1282_v28  ;;  %v1251_v33 = vsel %vm1250_vm3, 0.0, %v1249_v26 }
  0x1f   :  { %v1268_v31 = vadd.f32 %v1266_v27, %v1249_v26  ;;  %v1300_v32 = vmul.f32 %v1299_v29, %v1299_v29  ;;  %v1267_v34 = vadd.f32 %v1266_v27, %v1251_v33 }
  0x21   :  { %v1285_v35 = vadd.f32 %v1283_v30, %v1268_v31  ;;  %v1284_v36 = vadd.f32 %v1283_v30, %v1267_v34  ;;  %v1302_v37 = vsel %vm1301_vm4, 0.0, %v1300_v32 }
  0x23   :  { %v1304_v38 = vadd.f32 %v1300_v32, %v1285_v35  ;;  %v1303_v39 = vadd.f32 %v1302_v37, %v1284_v36 }
  0x25   :  { %1305 = vadd.xlane.f32.xlu0 %v1304_v38 }
  0x29   :  { %1313 = vadd.xlane.f32.xlu0 %v1303_v39 }
  0xae   :  { %v1306_v40 = vpop.xlane.xlu0 %1305 }
  0xaf   :  { %v1307_v41 = vrot.slane %v1306_v40, 4 }
  0xb1   :  { %v1308_v42 = vadd.f32 %v1307_v41, %v1306_v40 }
  0xb2   :  { %v1314_v43 = vpop.xlane.xlu0 %1313 }
  0xb3   :  { %v1309_v44 = vrot.slane %v1308_v42, 2  ;;  %v1315_v45 = vrot.slane %v1314_v43, 4 }
  0xb5   :  { %v1316_v46 = vadd.f32 %v1315_v45, %v1314_v43  ;;  %v1310_v47 = vadd.f32 %v1309_v44, %v1308_v42 }
  0xb7   :  { %v1317_v48 = vrot.slane %v1316_v46, 2  ;;  %v1311_v50 = vrot.slane %v1310_v47, 1 }
  0xb9   :  { %v1318_v49 = vadd.f32 %v1317_v48, %v1316_v46  ;;  %v1312_v53 = vadd.f32 %v1311_v50, %v1310_v47 }
  0xbb   :  { %v1319_v51 = vrot.slane %v1318_v49, 1 }
  0xbd   :  { %v1320_v52 = vadd.f32 %v1319_v51, %v1318_v49 }
  0xbf   :  { %1400 = vpush %v1320_v52 }
  0xc0   :  { %1402 = vpush %v1312_v53 }
  0xf0   :  { %s1401_s23 = spop %1400 }
  0xf1   :  { %s1403_s24 = spop %1402 }
  0xf2   :  { %s1323_s25 = smul.f32 1e-10, %s1403_s24 }
  0xf4   :  { %p1324_p0 = scmp.le.f32.partialorder %s1401_s23, %s1323_s25 }
  0xf5   :  { %s1636_s26 = smov (!%p1324_p0), 0  }
  0xf6   :  { %1327 = sbr.rel (%p1324_p0) target bundleno = 928 (0x3a0), region = 324 }
  0xfb LB: > { %s1641_s27 = smov 0   ;;  %s1535_s26 = sphi %s1636_s26, %s1839_s26  }
  0xfc LB: >> { %s432_s28 = smov [#allocation23]  ;;  %v436_v5 = vmov %v1610_v5  ;;  %v439_v6 = vmov %v1612_v6  ;;  %s452_s29 = smov [#allocation24]  ;;  %vm755_vm14 = vcmp.eq.s32.totalorder %v1612_v6, 0  ;;  %vm767_vm15 = vcmp.eq.s32.totalorder %v1612_v6, 3  ;;  %s1539_s27 = sphi %s1641_s27, %s431_s27  }
  0xfd   : >> { %v456_v5 = vmov %v1610_v5  ;;  %v459_v6 = vmov %v1612_v6  ;;  %v440_v54 = vld [vmem:[%s432_s28] sm:$0xf]  ;;  %vm443_vm5 = vcmp.eq.s32.totalorder %v439_v6, %v436_v5  ;;  %s472_s30 = smov [#allocation26]  ;;  %s433_s10 = smov [#allocation27] }
  0xfe   : >> { %vm463_vm6 = vcmp.eq.s32.totalorder %v459_v6, %v456_v5  ;;  %v476_v5 = vmov %v1610_v5  ;;  %v479_v6 = vmov %v1612_v6  ;;  %v444_v55 = vsel %vm443_vm5, %v440_v54, 0.0  ;;  %v460_v56 = vld [vmem:[%s452_s29] sm:$0xf]  ;;  %s453_s11 = smov [#allocation28]  ;;  %s473_s12 = smov [#allocation29] }
  0xff   : >> { %vm483_vm7 = vcmp.eq.s32.totalorder %v479_v6, %v476_v5  ;;  %v445_v57 = vrot.slane %v444_v55, 4  ;;  %v464_v58 = vsel %vm463_vm6, %v460_v56, 0.0  ;;  %v480_v59 = vld [vmem:[%s472_s30] sm:$0xf]  ;;  %s496_s13 = smov [#allocation28]  ;;  %s494_s14 = smov [#allocation27]  ;;  %v545_v5 = vmov %v1610_v5 }
 0x100   : >> { %v465_v60 = vrot.slane %v464_v58, 4  ;;  %v484_v61 = vsel %vm483_vm7, %v480_v59, 0.0  ;;  %s498_s15 = smov [#allocation29]  ;;  %s533_s16 = smov [#allocation30]  ;;  %v548_v6 = vmov %v1612_v6  ;;  %v560_v5 = vmov %v1610_v5 }
 0x101   : >> { %v446_v62 = vadd.f32 %v445_v57, %v444_v55  ;;  %v485_v63 = vrot.slane %v484_v61, 4  ;;  %s535_s0 = smov [#allocation31]  ;;  %s492_s1 = smov [#allocation32]  ;;  %v563_v6 = vmov %v1612_v6  ;;  %vm550_vm12 = vcmp.eq.s32.totalorder %v548_v6, %v545_v5 }
 0x102   : >> { %v466_v0 = vadd.f32 %v465_v60, %v464_v58  ;;  %s493_s2 = smov [#allocation33]  ;;  %s537_s1 = smov %s492_s1  ;;  %vm565_vm13 = vcmp.eq.s32.totalorder %v563_v6, %v560_v5  ;;  %v658_v5 = vmov %v1610_v5  ;;  %v661_v6 = vmov %v1612_v6 }
 0x103   : >> { %v447_v1 = vrot.slane %v446_v62, 2  ;;  %v486_v2 = vadd.f32 %v485_v63, %v484_v61  ;;  %s539_s2 = smov %s493_s2  ;;  %s541_s3 = smov [#allocation32]  ;;  %v672_v5 = vmov %v1610_v5  ;;  %v675_v6 = vmov %v1612_v6 }
 0x104   : >> { %v467_v3 = vrot.slane %v466_v0, 2  ;;  %s556_s17 = smov [#allocation33]  ;;  %s554_s18 = smov [#allocation34]  ;;  %vm665_vm0 = vcmp.eq.s32.totalorder %v661_v6, %v658_v5  ;;  %v631_v5 = vmov %v1610_v5  ;;  %v634_v6 = vmov %v1612_v6 }
 0x105   : >> { %v448_v4 = vadd.f32 %v447_v1, %v446_v62  ;;  %v487_v7 = vrot.slane %v486_v2, 2  ;;  %s571_s19 = smov [#allocation34]  ;;  %s1656_s20 = smov [#allocation23]  ;;  %v645_v5 = vmov %v1610_v5  ;;  %v648_v6 = vmov %v1612_v6 }
 0x106   : >> { %v468_v8 = vadd.f32 %v467_v3, %v466_v0  ;;  %s569_s21 = smov [#allocation35]  ;;  %s1658_s22 = smov [#allocation24]  ;;  %v579_v53 = vld [vmem:[%s1656_s20] sm:$0xf]  ;;  %vm680_vm1 = vcmp.eq.s32.totalorder %v675_v6, %v672_v5  ;;  %vm639_vm3 = vcmp.eq.s32.totalorder %v634_v6, %v631_v5  ;;  %vm652_vm4 = vcmp.eq.s32.totalorder %v648_v6, %v645_v5 }
 0x107   : >> { %v449_v9 = vrot.slane %v448_v4, 1  ;;  %v488_v10 = vadd.f32 %v487_v7, %v486_v2  ;;  %s1660_s23 = smov [#allocation25]  ;;  %s1662_s24 = smov [#allocation26]  ;;  %v580_v54 = vld [vmem:[%s1658_s22] sm:$0xf]  ;;  %vm694_vm5 = vcmp.eq.s32.totalorder %v1610_v5, 0 }
 0x108   : >> { %v469_v11 = vrot.slane %v468_v8, 1  ;;  %s1664_s25 = smov [#allocation12]  ;;  %s1666_s28 = smov [#allocation15]  ;;  %v581_v55 = vld [vmem:[%s1660_s23] sm:$0xf]  ;;  %vm698_vm6 = vcmp.eq.s32.totalorder %v1610_v5, 1 }
 0x109   : >> { %v450_v12 = vadd.f32 %v449_v9, %v448_v4  ;;  %v489_v13 = vrot.slane %v488_v10, 1  ;;  %s1668_s29 = smov [#allocation18]  ;;  %s795_s30 = smov [#allocation34]  ;;  %v582_v56 = vld [vmem:[%s1662_s24] sm:$0xf]  ;;  %vm711_vm7 = vcmp.eq.s32.totalorder %v1610_v5, 3 }
 0x10a   : >> { %v470_v14 = vadd.f32 %v469_v11, %v468_v8  ;;  %v803_v57 = vld [vmem:[%s1664_s25] sm:$0xf]  ;;  %s431_s27 = sadd.s32 1, %s1539_s27  }
 0x10b   : >> { %451 = vst [vmem:[%s433_s10] sm:$0x1] %v450_v12  ;;  %v490_v15 = vadd.f32 %v489_v13, %v488_v10  ;;  %s1672_s10 = smov [#allocation20]  ;;  %v804_v58 = vld [vmem:[%s1666_s28] sm:$0xf]  ;;  %p428_p1 = scmp.ge.s32.totalorder %s431_s27, 7  }
 0x10c   : >> { %471 = vst [vmem:[%s453_s11] sm:$0x1] %v470_v14  ;;  %v805_v59 = vld [vmem:[%s1668_s29] sm:$0xf]  ;;  %s573_s11 = smov [#allocation35]  ;;  %v332_v5 = vmov (%p428_p1), %v1610_v5  ;;  %v335_v6 = vmov (%p428_p1), %v1612_v6 }
 0x10d   : >> { %491 = vst [vmem:[%s473_s12] sm:$0x1] %v490_v15  ;;  %v806_v61 = vld [vmem:[%s1672_s10] sm:$0xf]  ;;  %s797_s12 = smov [#allocation35]  ;;  %v385_v5 = vmov (%p428_p1), %v1610_v5 }
 0x112   : >> { %v495_v18 = vld [vmem:[%s494_s14] sm:$0xff]  ;;  %s601_s14 = smov [#allocation33] }
 0x113   : >> { %v497_v16 = vld [vmem:[%s496_s13] sm:$0xff]  ;;  %v518_v33 = vand.u32 2147483647, %v495_v18  ;;  %s599_s13 = smov [#allocation32] }
 0x114   : >> { %v501_v17 = vmul.f32 2.0, %v497_v16  ;;  %v499_v19 = vld [vmem:[%s498_s15] sm:$0xff]  ;;  %v519_v36 = vand.u32 2147483647, %v497_v16  ;;  %s1688_s15 = smov [#allocation12] }
 0x115   : >> { %v500_v20 = vsub.f32 %v499_v19, %v495_v18  ;;  %v520_v34 = vand.u32 2147483647, %v499_v19 }
 0x116   : >> { %1431 = vrcp.f32 %v501_v17 }
 0x117   : >> { %v521_v35 = vmin.f32 %v518_v33, %v520_v34 }
 0x119   : >> { %v522_v37 = vmul.f32 1.1920929e-08, %v521_v35 }
 0x11b   : >> { %vm523_vm11 = vcmp.le.f32.partialorder %v519_v36, %v522_v37 }
 0x123   : >> { %v1432_v21 = vpop.eup %1431 }
 0x124   : >> { %v503_v22 = vmul.f32 %v1432_v21, %v500_v20 }
 0x126   : >> { %v505_v23 = vmul.f32 %v503_v22, %v503_v22  ;;  %vm504_vm10 = vcmp.ge.f32.partialorder %v503_v22, 0.0 }
 0x128   : >> { %v506_v24 = vadd.f32 1.0, %v505_v23 }
 0x12a   : >> { %1433 = vrsqrt.f32 %v506_v24  ;;  %vm509_vm8 = vcmp.eq.f32.partialorder %v506_v24, inf  ;;  %v512_v26 = vand.u32 2147483648, %v506_v24  ;;  %vm511_vm9 = vcmp.eq.f32.partialorder %v506_v24, 0.0 }
 0x137   : >> { %v1434_v25 = vpop.eup %1433 }
 0x138   : >> { %v508_v27 = vmul.f32 %v1434_v25, %v506_v24 }
 0x13a   : >> { %v510_v28 = vsel %vm509_vm8, %v506_v24, %v508_v27  ;;  %vm347_vm8 = vcmp.eq.s32.totalorder (%p428_p1), %v335_v6, %v332_v5  ;;  %v388_v6 = vmov (%p428_p1), %v1612_v6  ;;  %v351_v5 = vmov (%p428_p1), %v1610_v5 }
 0x13b   : >> { %v513_v29 = vsel %vm511_vm9, %v512_v26, %v510_v28  ;;  %v354_v6 = vmov (%p428_p1), %v1612_v6  ;;  %v368_v5 = vmov (%p428_p1), %v1610_v5  ;;  %vm400_vm9 = vcmp.eq.s32.totalorder (%p428_p1), %v388_v6, %v385_v5 }
 0x13c   : >> { %v514_v30 = vxor.u32 2147483648, %v513_v29  ;;  %v371_v6 = vmov (%p428_p1), %v1612_v6 }
 0x13e   : >> { %v515_v31 = vsel %vm504_vm10, %v513_v29, %v514_v30 }
 0x13f   : >> { %v516_v32 = vadd.f32 %v515_v31, %v503_v22 }
 0x141   : >> { %1435 = vrcp.f32 %v516_v32 }
 0x14e   : >> { %v1436_v38 = vpop.eup %1435 }
 0x14f   : >> { %v524_v39 = vsel %vm523_vm11, 0.0, %v1436_v38 }
 0x150   : >> { %v525_v40 = vmul.f32 %v524_v39, %v524_v39  ;;  %v529_v41 = vmul.f32 %v524_v39, %v497_v16 }
 0x152   : >> { %v526_v42 = vadd.f32 1.0, %v525_v40  ;;  %v530_v43 = vsub.f32 %v495_v18, %v529_v41  ;;  %v532_v44 = vadd.f32 %v529_v41, %v499_v19 }
 0x154   : >> { %1437 = vrsqrt.f32 %v526_v42  ;;  %534 = vst [vmem:[%s533_s16] sm:$0xff] %v530_v43  ;;  %536 = vst [vmem:[%s535_s0] sm:$0xff] %v532_v44  ;;  %s1690_s16 = smov [#allocation25]  ;;  %s1692_s0 = smov [#allocation26] }
 0x161   : >> { %v1438_v45 = vpop.eup %1437 }
 0x162   : >> { %538 = vst [vmem:[%s537_s1] sm:$0xff] %v1438_v45  ;;  %v528_v46 = vmul.f32 %v1438_v45, %v524_v39  ;;  %s1694_s1 = smov [#allocation23] }
 0x164   : >> { %540 = vst [vmem:[%s539_s2] sm:$0xff] %v528_v46  ;;  %s1696_s2 = smov [#allocation18] }
 0x169   : >> { %v542_v47 = vld [vmem:[%s541_s3] ss:$0 sm:$0xff]  ;;  %s1698_s3 = smov [#allocation15] }
 0x16a   : >> { %v551_v48 = vsel %vm550_vm12, %v542_v47, 0.0  ;;  %v600_v27 = vld [vmem:[%s599_s13] ss:$0 sm:$0xff]  ;;  %s771_s13 = smov [#allocation24] }
 0x16b   : >> { %552 = vadd.xlane.f32.xlu0 %v551_v48  ;;  %v557_v49 = vld [vmem:[%s556_s17] ss:$0 sm:$0xff]  ;;  %s1702_s17 = smov [#allocation20] }
 0x16c   : >> { %v566_v50 = vsel %vm565_vm13, %v557_v49, 0.0  ;;  %v602_v28 = vld [vmem:[%s601_s14] ss:$0 sm:$0xff]  ;;  %s748_s14 = smov [#allocation25] }
 0x16f   : >> { %567 = vadd.xlane.f32.xlu0 %v566_v50 }
 0x1f4   : >> { %v553_v51 = vpop.xlane.xlu0 %552 }
 0x1f5   : >> { %555 = vst [vmem:[%s554_s18] sm:$0xff] %v553_v51  ;;  %s1704_s18 = smov [#allocation24] }
 0x1f8   : >> { %v568_v52 = vpop.xlane.xlu0 %567 }
 0x1f9   : >> { %570 = vst [vmem:[%s569_s21] sm:$0xff] %v568_v52  ;;  %s668_s21 = smov [#allocation26] }
 0x1fc   : >> { %v572_v60 = vld [vmem:[%s571_s19] sm:$0xff]  ;;  %s669_s19 = smov [#allocation31] }
 0x1fd   : >> { %v796_v62 = vld [vmem:[%s795_s30] sm:$0xff]  ;;  %v583_v63 = vmul.f32 %v579_v53, %v572_v60  ;;  %v586_v0 = vmul.f32 %v580_v54, %v572_v60  ;;  %v590_v1 = vmul.f32 %v581_v55, %v572_v60  ;;  %v593_v2 = vmul.f32 %v582_v56, %v572_v60  ;;  %s684_s30 = smov [#allocation24] }
 0x1fe   : >> { %v807_v3 = vmul.f32 %v803_v57, %v796_v62  ;;  %v810_v4 = vmul.f32 %v804_v58, %v796_v62  ;;  %v814_v7 = vmul.f32 %v805_v59, %v796_v62  ;;  %v817_v8 = vmul.f32 %v806_v61, %v796_v62 }
 0x200   : >> { %v574_v9 = vld [vmem:[%s573_s11] sm:$0xff]  ;;  %s1749_s11 = smov [#allocation26] }
 0x201   : >> { %v798_v10 = vld [vmem:[%s797_s12] sm:$0xff]  ;;  %v584_v11 = vmul.f32 %v581_v55, %v574_v9  ;;  %v587_v12 = vmul.f32 %v582_v56, %v574_v9  ;;  %v589_v13 = vmul.f32 %v579_v53, %v574_v9  ;;  %v592_v14 = vmul.f32 %v580_v54, %v574_v9  ;;  %s747_s12 = smov [#allocation23] }
 0x202   : >> { %v808_v15 = vmul.f32 %v805_v59, %v798_v10  ;;  %v811_v16 = vmul.f32 %v806_v61, %v798_v10  ;;  %v813_v17 = vmul.f32 %v803_v57, %v798_v10  ;;  %v816_v18 = vmul.f32 %v804_v58, %v798_v10  ;;  %v676_v59 = vld [vmem:[%s669_s19] ss:$0 sm:$0xff] }
 0x203   : >> { %v585_v19 = vsub.f32 %v583_v63, %v584_v11  ;;  %v588_v20 = vsub.f32 %v586_v0, %v587_v12  ;;  %v591_v21 = vadd.f32 %v590_v1, %v589_v13  ;;  %v594_v22 = vadd.f32 %v593_v2, %v592_v14 }
 0x204   : >> { %v809_v23 = vsub.f32 %v807_v3, %v808_v15  ;;  %v812_v24 = vsub.f32 %v810_v4, %v811_v16  ;;  %v815_v25 = vadd.f32 %v814_v7, %v813_v17  ;;  %v818_v26 = vadd.f32 %v817_v8, %v816_v18 }
 0x205   : >> { %596 = vst [vmem:[%s1658_s22] sm:$0xf] %v588_v20  ;;  %598 = vst [vmem:[%s1662_s24] sm:$0xf] %v594_v22  ;;  %s628_s22 = smov [#allocation30]  ;;  %s642_s24 = smov [#allocation24] }
 0x206   : >> { %595 = vst [vmem:[%s1656_s20] sm:$0xf] %v585_v19  ;;  %597 = vst [vmem:[%s1660_s23] sm:$0xf] %v591_v21  ;;  %s655_s20 = smov [#allocation25]  ;;  %s627_s23 = smov [#allocation23]  ;;  %v635_v63 = vld [vmem:[%s628_s22] ss:$0 sm:$0xff] }
 0x207   : >> { %819 = vst [vmem:[%s1664_s25] sm:$0xf] %v809_v23  ;;  %820 = vst [vmem:[%s1666_s28] sm:$0xf] %v812_v24  ;;  %s1746_s25 = smov [#allocation25]  ;;  %s1542_s28 = smov 1  }
 0x208   : >> { %821 = vst [vmem:[%s1668_s29] sm:$0xf] %v815_v25  ;;  %822 = vst [vmem:[%s1672_s10] sm:$0xf] %v818_v26  ;;  %s683_s29 = smov [#allocation23]  ;;  %s1543_s10 = smov 127  }
 0x20c   : >> { %v610_v30 = vld [vmem:[%s1692_s0] sm:$0xf] }
 0x20d   : >> { %v609_v29 = vld [vmem:[%s1690_s16] sm:$0xf]  ;;  %v618_v36 = vmul.f32 %v610_v30, %v602_v28  ;;  %v621_v42 = vmul.f32 %v610_v30, %v600_v27 }
 0x20e   : >> { %v607_v31 = vld [vmem:[%s1694_s1] sm:$0xf]  ;;  %v617_v35 = vmul.f32 %v609_v29, %v600_v27  ;;  %v620_v37 = vmul.f32 %v609_v29, %v602_v28 }
 0x20f   : >> { %v825_v32 = vld [vmem:[%s1688_s15] ss:$0 sm:$0xff]  ;;  %v1387_v34 = vld [vmem:[%s1688_s15 + $0x3] ss:$0 sm:$0xff]  ;;  %v611_v48 = vmul.f32 %v607_v31, %v600_v27  ;;  %v614_v49 = vmul.f32 %v607_v31, %v602_v28 }
 0x210   : >> { %v1386_v33 = vld [vmem:[%s1688_s15 - $0x1] sm:$0xe]  ;;  %v1391_v45 = vld [vmem:[%s1698_s3 + $0x3] ss:$0 sm:$0xff]  ;;  %v619_v47 = vsub.f32 %v617_v35, %v618_v36  ;;  %v622_v53 = vadd.f32 %v621_v42, %v620_v37 }
 0x211   : >> { %v832_v38 = vsel %vm755_vm14, %v825_v32, %v1386_v33  ;;  %v836_v39 = vld [vmem:[%s1696_s2] ss:$0 sm:$0xff]  ;;  %v1389_v40 = vld [vmem:[%s1696_s2 + $0x1] sm:$0x7] }
 0x212   : >> { %v849_v41 = vld [vmem:[%s1698_s3] ss:$0 sm:$0xff]  ;;  %835 = vst [vmem:[%s1688_s15] sm:$0xf] %v832_v38  ;;  %v844_v43 = vsel %vm767_vm15, %v1387_v34, %v1389_v40  ;;  %v1393_v51 = vld [vmem:[%s1702_s17 + $0x1] sm:$0x7]  ;;  %625 = vst [vmem:[%s1690_s16] sm:$0xf] %v619_v47 }
 0x213   : >> { %v1390_v44 = vld [vmem:[%s1698_s3 - $0x1] sm:$0xe]  ;;  %1388 = vst [vmem:[%s1688_s15 + $0x1] sm:$0x1] %v836_v39  ;;  %846 = vst [vmem:[%s1696_s2] sm:$0xf] %v844_v43  ;;  %v868_v54 = vsel %vm767_vm15, %v1391_v45, %v1393_v51  ;;  %s772_s15 = smov [#allocation26] }
 0x214   : >> { %v860_v46 = vld [vmem:[%s1702_s17] ss:$0 sm:$0xff]  ;;  %v856_v50 = vsel %vm755_vm14, %v849_v41, %v1390_v44  ;;  %626 = vst [vmem:[%s1692_s0] sm:$0xf] %v622_v53  ;;  %s871_s16 = sadd.s32 (%p428_p1), 1, %s1535_s26   ;;  %s336_s0 = smov (%p428_p1), [#allocation23] }
 0x215   : >> { %v608_v52 = vld [vmem:[%s1704_s18] sm:$0xf]  ;;  %859 = vst [vmem:[%s1698_s3] sm:$0xf] %v856_v50  ;;  %870 = vst [vmem:[%s1702_s17] sm:$0xf] %v868_v54  ;;  %s372_s2 = smov (%p428_p1), [#allocation25]  ;;  %p424_p2 = scmp.ge.s32.totalorder (%p428_p1), %s871_s16, 15 }
 0x216   : >> { %v612_v55 = vmul.f32 %v608_v52, %v602_v28  ;;  %v615_v56 = vmul.f32 %v608_v52, %v600_v27  ;;  %1392 = vst [vmem:[%s1698_s3 + $0x1] sm:$0x1] %v860_v46  ;;  %s389_s3 = smov (%p428_p1), [#allocation26]  ;;  %s1839_s26 = smov (%p428_p1), %s871_s16 }
 0x218   : >> { %v613_v57 = vsub.f32 %v611_v48, %v612_v55  ;;  %v616_v58 = vadd.f32 %v615_v56, %v614_v49 }
 0x219   : >> { %v662_v60 = vld [vmem:[%s655_s20] sm:$0xf] }
 0x21a   : >> { %623 = vst [vmem:[%s1694_s1] sm:$0xf] %v613_v57  ;;  %624 = vst [vmem:[%s1704_s18] sm:$0xf] %v616_v58  ;;  %v666_v61 = vsel %vm665_vm0, 0.0, %v662_v60  ;;  %s355_s1 = smov (%p428_p1), [#allocation24] }
 0x21b   : >> { %v677_v62 = vld [vmem:[%s668_s21] sm:$0xf]  ;;  %667 = vst [vmem:[%s655_s20] sm:$0xf] %v666_v61 }
 0x21c   : >> { %v681_v0 = vsel %vm680_vm1, %v676_v59, %v677_v62 }
 0x21d   : >> { %682 = vst [vmem:[%s668_s21] sm:$0xf] %v681_v0 }
 0x221   : >> { %v636_v1 = vld [vmem:[%s627_s23] sm:$0xf] }
 0x222   : >> { %v649_v2 = vld [vmem:[%s642_s24] sm:$0xf]  ;;  %v640_v3 = vsel %vm639_vm3, %v635_v63, %v636_v1 }
 0x223   : >> { %v653_v4 = vsel %vm652_vm4, 0.0, %v649_v2  ;;  %641 = vst [vmem:[%s627_s23] sm:$0xf] %v640_v3  ;;  %v721_v7 = vld [vmem:[%s1746_s25] sm:$0xf] }
 0x224   : >> { %654 = vst [vmem:[%s642_s24] sm:$0xf] %v653_v4  ;;  %722 = vrot.lane.b32.xlu0 %v721_v7, %s1542_s28  ;;  %v717_v11 = vld [vmem:[%s1749_s11] sm:$0xf] }
 0x225   : >> { %v738_v12 = vld [vmem:[%s1749_s11] sm:$0xf] }
 0x226   : >> { %v720_v30 = vld [vmem:[%s1746_s25] sm:$0xf] }
 0x22a   : >> { %v689_v8 = vld [vmem:[%s683_s29] sm:$0xf] }
 0x22b   : >> { %690 = vrot.lane.b32.xlu1 %v689_v8, %s1542_s28  ;;  %v685_v9 = vld [vmem:[%s684_s30] sm:$0xf] }
 0x22c   : >> { %v706_v10 = vld [vmem:[%s684_s30] sm:$0xf] }
 0x22d   : >> { %v688_v18 = vld [vmem:[%s683_s29] sm:$0xf] }
 0x22f   : >> { %686 = vrot.lane.b32.xlu1 %v685_v9, %s1542_s28 }
 0x233   : >> { %707 = vrot.lane.b32.xlu1 %v706_v10, %s1543_s10 }
 0x237   : >> { %718 = vrot.lane.b32.xlu1 %v717_v11, %s1542_s28 }
 0x23b   : >> { %739 = vrot.lane.b32.xlu1 %v738_v12, %s1543_s10 }
 0x296   : >> { %v723_v20 = vpop.permute.xlu0 %722 }
 0x297   : >> { %v727_v22 = vsel %vm694_vm5, %v721_v7, %v723_v20 }
 0x29d   : >> { %v691_v13 = vpop.permute.xlu1 %690 }
 0x29e   : >> { %v695_v14 = vsel %vm694_vm5, %v689_v8, %v691_v13 }
 0x2a1   : >> { %v687_v15 = vpop.permute.xlu1 %686 }
 0x2a2   : >> { %v699_v16 = vsel %vm698_vm6, %v687_v15, %v695_v14 }
 0x2a3   : >> { %v705_v17 = vsel %vm1245_vm2, %v699_v16, 0.0 }
 0x2a4   : >> { %713 = vst [vmem:[%s683_s29] sm:$0xf] %v705_v17 }
 0x2a5   : >> { %v708_v19 = vpop.permute.xlu1 %707 }
 0x2a6   : >> { %v712_v21 = vsel %vm711_vm7, %v688_v18, %v708_v19 }
 0x2a7   : >> { %714 = vst [vmem:[%s684_s30] sm:$0xf] %v712_v21 }
 0x2a9   : >> { %v719_v23 = vpop.permute.xlu1 %718 }
 0x2aa   : >> { %v731_v24 = vsel %vm698_vm6, %v719_v23, %v727_v22 }
 0x2ab   : >> { %v749_v25 = vld [vmem:[%s747_s12] ss:$0 sm:$0xff]  ;;  %v1379_v27 = vld [vmem:[%s747_s12 + $0x3] ss:$0 sm:$0xff]  ;;  %v737_v29 = vsel %vm1245_vm2, %v731_v24, 0.0 }
 0x2ac   : >> { %v1378_v26 = vld [vmem:[%s747_s12 - $0x1] sm:$0xe]  ;;  %745 = vst [vmem:[%s1746_s25] sm:$0xf] %v737_v29 }
 0x2ad   : >> { %v756_v28 = vsel %vm755_vm14, %v749_v25, %v1378_v26  ;;  %v740_v31 = vpop.permute.xlu1 %739 }
 0x2ae   : >> { %759 = vst [vmem:[%s747_s12] sm:$0xf] %v756_v28  ;;  %v773_v32 = vld [vmem:[%s771_s13] ss:$0 sm:$0xff]  ;;  %v1383_v34 = vld [vmem:[%s771_s13 + $0x3] ss:$0 sm:$0xff]  ;;  %v744_v35 = vsel %vm711_vm7, %v720_v30, %v740_v31 }
 0x2af   : >> { %v1382_v33 = vld [vmem:[%s771_s13 - $0x1] sm:$0xe]  ;;  %746 = vst [vmem:[%s1749_s11] sm:$0xf] %v744_v35 }
 0x2b0   : >> { %v780_v36 = vsel %vm755_vm14, %v773_v32, %v1382_v33 }
 0x2b1   : >> { %783 = vst [vmem:[%s771_s13] sm:$0xf] %v780_v36 }
 0x2b3   : >> { %v760_v37 = vld [vmem:[%s748_s14] ss:$0 sm:$0xff]  ;;  %v1381_v38 = vld [vmem:[%s748_s14 + $0x1] sm:$0x7] }
 0x2b4   : >> { %1380 = vst [vmem:[%s747_s12 + $0x1] sm:$0x1] %v760_v37  ;;  %v768_v39 = vsel %vm767_vm15, %v1379_v27, %v1381_v38 }
 0x2b5   : >> { %770 = vst [vmem:[%s748_s14] sm:$0xf] %v768_v39 }
 0x2b6   : >> { %v784_v40 = vld [vmem:[%s772_s15] ss:$0 sm:$0xff]  ;;  %v1385_v41 = vld [vmem:[%s772_s15 + $0x1] sm:$0x7] }
 0x2b7   : >> { %1384 = vst [vmem:[%s771_s13 + $0x1] sm:$0x1] %v784_v40  ;;  %v792_v42 = vsel %vm767_vm15, %v1383_v34, %v1385_v41 }
 0x2b8   : >> { %794 = vst [vmem:[%s772_s15] sm:$0xf] %v792_v42  ;;  %430 = sbr.rel (!%p428_p1) target bundleno = 252 (0xfc), region = 319 }
 0x2bb   : > { %v342_v43 = vld [vmem:[%s336_s0] sm:$0xf] (%p428_p1) }
 0x2bc   : > { %v343_v45 = vsel (%p428_p1), %vm1245_vm2, %v342_v43, 0.0  ;;  %v378_v47 = vld [vmem:[%s372_s2] sm:$0xf] (%p428_p1) }
 0x2bd   : > { %v344_v49 = vmul.f32 %v343_v45, %v343_v45  ;;  %v379_v51 = vsel %vm1245_vm2, %v378_v47, 0.0 }
 0x2be   : > { %v361_v44 = vld [vmem:[%s355_s1] sm:$0xf]  ;;  %v380_v53 = vmul.f32 %v379_v51, %v379_v51 }
 0x2bf   : > { %v362_v46 = vsel %vm1245_vm2, %v361_v44, 0.0  ;;  %v395_v48 = vld [vmem:[%s389_s3] sm:$0xf]  ;;  %v348_v56 = vsel %vm347_vm8, 0.0, %v344_v49 }
 0x2c0   : > { %v363_v50 = vmul.f32 %v362_v46, %v362_v46  ;;  %v396_v52 = vsel %vm1245_vm2, %v395_v48, 0.0 }
 0x2c1   : > { %v397_v55 = vmul.f32 %v396_v52, %v396_v52 }
 0x2c2   : > { %v365_v54 = vadd.f32 %v363_v50, %v344_v49  ;;  %v364_v57 = vadd.f32 %v363_v50, %v348_v56 }
 0x2c3   : > { %v401_v60 = vsel %vm400_vm9, 0.0, %v397_v55 }
 0x2c4   : > { %v382_v58 = vadd.f32 %v380_v53, %v365_v54  ;;  %v381_v59 = vadd.f32 %v380_v53, %v364_v57 }
 0x2c6   : > { %v403_v61 = vadd.f32 %v397_v55, %v382_v58  ;;  %v402_v62 = vadd.f32 %v401_v60, %v381_v59 }
 0x2c8   : > { %404 = vadd.xlane.f32.xlu0 %v403_v61 }
 0x2cc   : > { %412 = vadd.xlane.f32.xlu0 %v402_v62 }
 0x351   : > { %v405_v63 = vpop.xlane.xlu0 %404 }
 0x352   : > { %v406_v0 = vrot.slane %v405_v63, 4 }
 0x354   : > { %v407_v1 = vadd.f32 %v406_v0, %v405_v63 }
 0x355   : > { %v413_v2 = vpop.xlane.xlu0 %412 }
 0x356   : > { %v408_v3 = vrot.slane %v407_v1, 2  ;;  %v414_v4 = vrot.slane %v413_v2, 4 }
 0x358   : > { %v415_v7 = vadd.f32 %v414_v4, %v413_v2  ;;  %v409_v8 = vadd.f32 %v408_v3, %v407_v1 }
 0x35a   : > { %v416_v9 = vrot.slane %v415_v7, 2  ;;  %v410_v11 = vrot.slane %v409_v8, 1 }
 0x35c   : > { %v417_v10 = vadd.f32 %v416_v9, %v415_v7  ;;  %v411_v14 = vadd.f32 %v410_v11, %v409_v8 }
 0x35e   : > { %v418_v12 = vrot.slane %v417_v10, 1 }
 0x360   : > { %v419_v13 = vadd.f32 %v418_v12, %v417_v10 }
 0x362   : > { %1404 = vpush %v419_v13 }
 0x363   : > { %1406 = vpush %v411_v14 }
 0x393   : > { %s1405_s27 = spop %1404 }
 0x394   : > { %s1407_s17 = spop %1406 }
 0x395   : > { %s422_s18 = smul.f32 1e-10, %s1407_s17 }
 0x397   : > { %p423_p3 = scmp.le.f32.partialorder %s1405_s27, %s422_s18 }
 0x399   : > { %p425_p4 = por %p424_p2, %p423_p3 }
 0x39b   :  { %873 = sbr.rel (!%p425_p4) target bundleno = 251 (0xfb), region = 330 }
 0x3a0 PF:  { %v942_v15 = vld [vmem:[#allocation15] sm:$0xf]  ;;  %s874_s19 = smov [#allocation23]  ;;  %v878_v5 = vmov %v1610_v5  ;;  %v881_v6 = vmov %v1612_v6  ;;  %v934_v16 = vld [vmem:[#allocation12] sm:$0xf]  ;;  %s1544_s20 = smov [#allocation16]  }
 0x3a1   :  { %v898_v5 = vmov %v1610_v5  ;;  %v901_v6 = vmov %v1612_v6  ;;  %945 = vst [vmem:[#allocation16] sm:$0xf] %v942_v15  ;;  %s1102_s21 = sshll.u32 %s1544_s20, 4  ;;  %v882_v17 = vld [vmem:[%s874_s19] sm:$0xf]  ;;  %vm885_vm10 = vcmp.eq.s32.totalorder %v881_v6, %v878_v5  ;;  %s894_s26 = smov [#allocation26]  ;;  %s1103_s21 = int_to_ptr.vmem [resolvable:$true] %s1102_s21 }
 0x3a2   :  { %vm905_vm11 = vcmp.eq.s32.totalorder %v901_v6, %v898_v5  ;;  %937 = vst [vmem:[#allocation13] sm:$0xf] %v934_v16  ;;  %v950_v18 = vld [vmem:[#allocation18] sm:$0xf]  ;;  %v886_v19 = vsel %vm885_vm10, %v882_v17, 0.0  ;;  %s1439_s22 = scalar_lea.vmem %s1103_s21, 64  ;;  %p1444_p6 = scmp.lt.s32.totalorder %s1103_s21, %s1103_s21 }
 0x3a3   :  { %953 = vst [vmem:[#allocation19] sm:$0xf] %v950_v18  ;;  %v958_v20 = vld [vmem:[#allocation20] sm:$0xf]  ;;  %p1440_p5 = scmp.ne.s32.totalorder %s1103_s21, %s1439_s22  ;;  %p1445_p7 = scmp.lt.s32.totalorder %s1439_s22, %s1439_s22 }
 0x3a5   :  { %p1446_p8 = por %p1445_p7, %p1444_p6 }
 0x3a7   :  { %p1447_p9 = pnand %p1446_p8, %p1440_p5 }
 0x3a9   :  { %1450 = shalt.err (!%p1447_p9)
}
 0x3aa   :  { %1105 = dma.vmem_to_hbm [thread:$0]  %s1103_s21, 64, %s1836_s7, [#allocation17]   ;;  %v887_v21 = vrot.slane %v886_v19, 4  ;;  %v902_v22 = vld [vmem:[%s894_s26] sm:$0xf] }
 0x3ab   :  { %961 = vst [vmem:[#allocation21] sm:$0xf] %v958_v20  ;;  %v906_v23 = vsel %vm905_vm11, %v902_v22, 0.0  ;;  %s1545_s25 = smov [#allocation13]   ;;  %s1546_s29 = smov [#allocation19]  }
 0x3ac   :  { %v888_v24 = vadd.f32 %v887_v21, %v886_v19  ;;  %v907_v25 = vrot.slane %v906_v23, 4  ;;  %s1095_s28 = sshll.u32 %s1545_s25, 4  ;;  %s1109_s30 = sshll.u32 %s1546_s29, 4  ;;  %s1096_s28 = int_to_ptr.vmem [resolvable:$true] %s1095_s28  ;;  %s1110_s30 = int_to_ptr.vmem [resolvable:$true] %s1109_s30 }
 0x3ad   :  { %s1459_s10 = scalar_lea.vmem %s1096_s28, 64  ;;  %p1464_p11 = scmp.lt.s32.totalorder %s1096_s28, %s1096_s28 }
 0x3ae   :  { %v889_v26 = vrot.slane %v888_v24, 2  ;;  %v908_v27 = vadd.f32 %v907_v25, %v906_v23  ;;  %p1460_p10 = scmp.ne.s32.totalorder %s1096_s28, %s1459_s10  ;;  %p1465_p12 = scmp.lt.s32.totalorder %s1459_s10, %s1459_s10 }
 0x3b0   :  { %p1466_p13 = por %p1465_p12, %p1464_p11 }
 0x3b2   :  { %p1467_p0 = pnand %p1466_p13, %p1460_p10 }
 0x3b4   :  { %1470 = shalt.err (!%p1467_p0)
}
 0x3b5   :  { %1098 = dma.vmem_to_hbm [thread:$0]  %s1096_s28, 64, %s1835_s6, [#allocation14]   ;;  %v890_v5 = vadd.f32 %v889_v26, %v888_v24  ;;  %v909_v6 = vrot.slane %v908_v27, 2 }
 0x3b6   :  { %s1479_s12 = scalar_lea.vmem %s1110_s30, 64  ;;  %p1484_p2 = scmp.lt.s32.totalorder %s1110_s30, %s1110_s30 }
 0x3b7   :  { %p1480_p1 = scmp.ne.s32.totalorder %s1110_s30, %s1479_s12  ;;  %p1485_p3 = scmp.lt.s32.totalorder %s1479_s12, %s1479_s12 }
 0x3b9   :  { %p1486_p4 = por %p1485_p3, %p1484_p2 }
 0x3bb   :  { %p1487_p5 = pnand %p1486_p4, %p1480_p1 }
 0x3bd   :  { %1490 = shalt.err (!%p1487_p5)
}
 0x3be   :  { %1112 = dma.vmem_to_hbm [thread:$0]  %s1110_s30, 64, %s1837_s8, [#allocation17]   ;;  %v891_v28 = vrot.slane %v890_v5, 1  ;;  %v910_v29 = vadd.f32 %v909_v6, %v908_v27 }
 0x3bf   :  { %s1547_s15 = smov [#allocation21]   ;;  %s875_s0 = smov [#allocation8] }
 0x3c0   :  { %s1116_s16 = sshll.u32 %s1547_s15, 4  ;;  %s1117_s16 = int_to_ptr.vmem [resolvable:$true] %s1116_s16 }
 0x3c1   :  { %s1499_s6 = scalar_lea.vmem %s1117_s16, 64  ;;  %p1504_p7 = scmp.lt.s32.totalorder %s1117_s16, %s1117_s16 }
 0x3c2   :  { %p1500_p6 = scmp.ne.s32.totalorder %s1117_s16, %s1499_s6  ;;  %p1505_p8 = scmp.lt.s32.totalorder %s1499_s6, %s1499_s6 }
 0x3c4   :  { %p1506_p9 = por %p1505_p8, %p1504_p7 }
 0x3c6   :  { %p1507_p10 = pnand %p1506_p9, %p1500_p6 }
 0x3c8   :  { %1510 = shalt.err (!%p1507_p10)
}
 0x3c9   :  { %1119 = dma.vmem_to_hbm [thread:$0]  %s1117_s16, 64, %s1838_s9, [#allocation22]   ;;  %v892_v30 = vadd.f32 %v891_v28, %v890_v5  ;;  %v911_v31 = vrot.slane %v910_v29, 1 }
 0x3ca   :  { %s895_s8 = smov [#allocation10] }
 0x3cb   :  { %893 = vst [vmem:[%s875_s0] sm:$0x1] %v892_v30  ;;  %v912_v32 = vadd.f32 %v911_v31, %v910_v29 }
 0x3cd   :  { %913 = vst [vmem:[%s895_s8] sm:$0x1] %v912_v32 }
 0x3d2   :  { %v918_v33 = vld [vmem:[#allocation8] sm:$0x1] }
 0x3d3   :  { %921 = vst [vmem:[#allocation9] sm:$0x1] %v918_v33 }
 0x3d4   :  { %v926_v34 = vld [vmem:[#allocation10] sm:$0x1] }
 0x3d5   :  { %929 = vst [vmem:[#allocation11] sm:$0x1] %v926_v34 }
 0x3da   :  { %v1025_v35 = vld [vmem:[#allocation9] sm:$0x1] }
 0x3db   :  { %1026 = vst [vmem:[%s1833_s4] sm:$0x1] %v1025_v35 }
 0x3dc   :  { %v1090_v36 = vld [vmem:[#allocation11] sm:$0x1] }
 0x3dd   :  { %1091 = vst [vmem:[%s1834_s5] sm:$0x1] %v1090_v36 }
 0x3de   :  { %1527 = dma.done.wait [#allocation14], 64  }
 0x3df   :  { %1528 = vsyncadd [#allocation14], 4294967232 }
 0x3e0   :  { %1529 = dma.done.wait [#allocation17], 128  }
 0x3e1   :  { %1530 = vsyncadd [#allocation17], 4294967168 }
 0x3e2   :  { %1531 = dma.done.wait [#allocation22], 64  }
 0x3e3   :  { %1532 = vsyncadd [#allocation22], 4294967232 }
 0x3e4   :  { %1128 = vsyncpa [#allocation14], 1 }
 0x3e5   :  { %1129 = vsyncpa [#allocation17], 1 }
 0x3e6   :  { %1130 = vsyncpa [#allocation22], 1 }

</bundles_post_ra>
